<compile_context>
chip_gen: v7x
topology: tpu7x:2x2x1
jax: 0.10.0
libtpu: 0.0.40
codegen_flags: <defaults>
</compile_context>

<pallas_src>
import jax
import jax.numpy as jnp
from jax.experimental import pallas as pl
from jax.experimental.pallas import tpu as pltpu


def _timewarp_kernel(t_ref, w1_ref, b1_ref, w2_ref, b2_ref, o_ref):
    # Layer 1: Linear(1 -> H).  K == 1, so the "matmul" is an outer product;
    # do it as a broadcasted multiply on the VPU instead of a degenerate MXU
    # contraction.
    t = t_ref[...]                               # (N, 1) f32
    h = t * w1_ref[...] + b1_ref[...]            # (N, H) via broadcast
    h = jnp.maximum(h, 0.0)                      # ReLU

    # Layer 2: Linear(H -> D_out), tiled over the output dim (grid axis 0).
    w2 = w2_ref[...]                             # (H, TN), f32 or bf16
    hm = h.astype(w2.dtype) if w2.dtype != h.dtype else h
    out = jnp.dot(hm, w2, preferred_element_type=jnp.float32)   # (N, TN) f32
    o_ref[...] = (out + b2_ref[...]).astype(o_ref.dtype)


def _tensorcores_per_chip() -> int:
    """Best-effort TC count per chip. Defaults to 1 (safe: single-step grid is
    optimal on v5e/v6e and merely forgoes the 2-TC split on v7x)."""
    try:
        kind = jax.devices()[0].device_kind.lower()
    except Exception:
        return 1
    return 2 if "v7" in kind else 1


def timewarp_forward(t, w1, b1, w2, b2, *, w2_dtype=None, num_out_tiles=None):
    """t: (N, 1) f32; returns (N, D_out) f32.

    w2_dtype: optional narrower dtype (e.g. jnp.bfloat16) for the W2 HBM read.
              Default None keeps exact f32 math.
    num_out_tiles: override the number of output tiles (grid steps). Default is
              chip-generation dependent (1 on v5e/v6e, 2 on v7x).
    """
    N = t.shape[0]
    H = w1.shape[1]
    D_out = w2.shape[1]

    if w2_dtype is not None and w2.dtype != w2_dtype:
        w2 = w2.astype(w2_dtype)

    if num_out_tiles is None:
        num_out_tiles = _tensorcores_per_chip()

    # Lane-dense output tile: multiple of 128 so stores stay unmasked. On a
    # multi-TC chip split D_out across tiles; otherwise take it whole. If
    # D_out is not a multiple of 128 we cannot split cleanly -> one full tile.
    if num_out_tiles > 1 and D_out % 128 == 0:
        tile_n_out = pl.cdiv(D_out // 128, num_out_tiles) * 128
    else:
        tile_n_out = D_out
    grid = (pl.cdiv(D_out, tile_n_out),)

    b1_2d = b1.reshape(1, H)
    b2_2d = b2.reshape(1, D_out)

    cost = pl.CostEstimate(
        flops=2 * N * H * D_out + 4 * N * H,      # dominated by layer-2 matmul
        transcendentals=0,
        bytes_accessed=(H * D_out * w2.dtype.itemsize          # W2 read (dominant)
                        + (N * D_out + D_out + N + 2 * H) * 4),
    )

    return pl.pallas_call(
        _timewarp_kernel,
        out_shape=jax.ShapeDtypeStruct((N, D_out), jnp.float32),
        grid=grid,
        in_specs=[
            pl.BlockSpec((N, 1), lambda j: (0, 0)),            # t  (full, invariant)
            pl.BlockSpec((1, H), lambda j: (0, 0)),            # W1 (full, invariant)
            pl.BlockSpec((1, H), lambda j: (0, 0)),            # b1 (full, invariant)
            pl.BlockSpec((H, tile_n_out), lambda j: (0, j)),   # W2 tile
            pl.BlockSpec((1, tile_n_out), lambda j: (0, j)),   # b2 tile
        ],
        out_specs=pl.BlockSpec((N, tile_n_out), lambda j: (0, j)),
        compiler_params=pltpu.CompilerParams(
            dimension_semantics=("parallel",)),
        cost_estimate=cost,
    )(t, w1, b1_2d, w2, b2_2d)


if __name__ == "__main__":
    HIDDEN_DIM = 64
    OUTPUT_DIM = 4096
    N = 8  # batch of scalar time values

    key = jax.random.PRNGKey(0)
    k_t, k_w1, k_b1, k_w2, k_b2 = jax.random.split(key, 5)

    # NOTE: the PyTorch module zero-inits all weights/biases (forward would be
    # identically zero). Use small deterministic random params so the kernel's
    # hot path is actually exercised; set ZERO_INIT=True for the module's exact
    # zero-initialized behavior.
    ZERO_INIT = False
    if ZERO_INIT:
        w1 = jnp.zeros((1, HIDDEN_DIM), jnp.float32)
        b1 = jnp.zeros((HIDDEN_DIM,), jnp.float32)
        w2 = jnp.zeros((HIDDEN_DIM, OUTPUT_DIM), jnp.float32)
        b2 = jnp.zeros((OUTPUT_DIM,), jnp.float32)
    else:
        w1 = 0.05 * jax.random.normal(k_w1, (1, HIDDEN_DIM), jnp.float32)
        b1 = 0.05 * jax.random.normal(k_b1, (HIDDEN_DIM,), jnp.float32)
        w2 = 0.05 * jax.random.normal(k_w2, (HIDDEN_DIM, OUTPUT_DIM), jnp.float32)
        b2 = 0.05 * jax.random.normal(k_b2, (OUTPUT_DIM,), jnp.float32)

    t = jax.random.normal(k_t, (N, 1), jnp.float32)

    # Pure-JAX reference (same math as the PyTorch forward).
    ref = jnp.maximum(t @ w1 + b1[None, :], 0.0) @ w2 + b2[None, :]

    # Default (exact f32, generation-specific grid) path.
    out = jax.block_until_ready(timewarp_forward(t, w1, b1, w2, b2))
    assert out.shape == (N, OUTPUT_DIM)
    assert jnp.allclose(out, ref, atol=1e-5, rtol=1e-5)

    # Optional bf16-W2 path (halves the dominant HBM read; looser tolerance).
    out_bf16 = jax.block_until_ready(
        timewarp_forward(t, w1, b1, w2, b2, w2_dtype=jnp.bfloat16))
    assert jnp.allclose(out_bf16, ref, atol=1e-2, rtol=1e-2)

    print("KERNEL_OK")
</pallas_src>

<mosaic_0001>
module attributes {stable_mosaic.version = 11 : i64} {
  func.func @_timewarp_kernel(%arg0: i32, %arg1: memref<8x1xf32, #tpu.memory_space<vmem>>, %arg2: memref<1x64xf32, #tpu.memory_space<vmem>>, %arg3: memref<1x64xf32, #tpu.memory_space<vmem>>, %arg4: memref<64x4096xf32, #tpu.memory_space<vmem>>, %arg5: memref<1x4096xf32, #tpu.memory_space<vmem>>, %arg6: memref<8x4096xf32, #tpu.memory_space<vmem>>) attributes {dimension_semantics = [#tpu.dimension_semantics<parallel>], iteration_bounds = array<i64: 1>, scalar_prefetch = 0 : i64, scratch_operands = 0 : i64, tpu.core_type = #tpu.core_type<tc>, window_params = [{pipeline_mode = #tpu.pipeline_mode<synchronous>, transform_indices = @transform_0, window_bounds = array<i64: 8, 1>}, {pipeline_mode = #tpu.pipeline_mode<synchronous>, transform_indices = @transform_1, window_bounds = array<i64: 1, 64>}, {pipeline_mode = #tpu.pipeline_mode<synchronous>, transform_indices = @transform_2, window_bounds = array<i64: 1, 64>}, {transform_indices = @transform_3, window_bounds = array<i64: 64, 4096>}, {transform_indices = @transform_4, window_bounds = array<i64: 1, 4096>}, {transform_indices = @transform_5, window_bounds = array<i64: 8, 4096>}]} {
    %c0 = arith.constant 0 : index
    %c0_0 = arith.constant 0 : index
    %0 = vector.load %arg1[%c0, %c0_0] : memref<8x1xf32, #tpu.memory_space<vmem>>, vector<8x1xf32>
    %c0_1 = arith.constant 0 : index
    %c0_2 = arith.constant 0 : index
    %1 = vector.load %arg2[%c0_1, %c0_2] : memref<1x64xf32, #tpu.memory_space<vmem>>, vector<1x64xf32>
    %2 = vector.broadcast %0 : vector<8x1xf32> to vector<8x64xf32>
    %3 = vector.broadcast %1 : vector<1x64xf32> to vector<8x64xf32>
    %4 = arith.mulf %2, %3 : vector<8x64xf32>
    %c0_3 = arith.constant 0 : index
    %c0_4 = arith.constant 0 : index
    %5 = vector.load %arg3[%c0_3, %c0_4] : memref<1x64xf32, #tpu.memory_space<vmem>>, vector<1x64xf32>
    %6 = vector.broadcast %5 : vector<1x64xf32> to vector<8x64xf32>
    %7 = arith.addf %4, %6 : vector<8x64xf32>
    %cst = arith.constant 0.000000e+00 : f32
    %8 = vector.broadcast %cst : f32 to vector<8x64xf32>
    %9 = arith.maximumf %7, %8 : vector<8x64xf32>
    %c0_5 = arith.constant 0 : index
    %c0_6 = arith.constant 0 : index
    %10 = vector.load %arg4[%c0_5, %c0_6] : memref<64x4096xf32, #tpu.memory_space<vmem>>, vector<64x4096xf32>
    %cst_7 = arith.constant dense<0.000000e+00> : vector<8x4096xf32>
    %11 = tpu.matmul %9, %10, %cst_7 {dimension_numbers = #tpu.dot_dimension_numbers<[1], [0], [0], [1], [0, 0, 1, 1], [], []>} : vector<8x64xf32>, vector<64x4096xf32>, vector<8x4096xf32> -> vector<8x4096xf32>
    %c0_8 = arith.constant 0 : index
    %c0_9 = arith.constant 0 : index
    %12 = vector.load %arg5[%c0_8, %c0_9] : memref<1x4096xf32, #tpu.memory_space<vmem>>, vector<1x4096xf32>
    %13 = vector.broadcast %12 : vector<1x4096xf32> to vector<8x4096xf32>
    %14 = arith.addf %11, %13 : vector<8x4096xf32>
    %c0_10 = arith.constant 0 : index
    %c0_11 = arith.constant 0 : index
    %15 = vector.load %arg6[%c0_10, %c0_11] : memref<8x4096xf32, #tpu.memory_space<vmem>>, vector<8x4096xf32>
    tpu.vector_store %arg6[%c0_10, %c0_11], %14 {strides = array<i32>} : memref<8x4096xf32, #tpu.memory_space<vmem>>, vector<8x4096xf32>,
    return
  }
  func.func @transform_0(%arg0: i32) -> (i32, i32) {
    %c0_i32 = arith.constant 0 : i32
    %c0_i32_0 = arith.constant 0 : i32
    %c0_i32_1 = arith.constant 0 : i32
    return %c0_i32, %c0_i32_0 : i32, i32
  }
  func.func @transform_1(%arg0: i32) -> (i32, i32) {
    %c0_i32 = arith.constant 0 : i32
    %c0_i32_0 = arith.constant 0 : i32
    %c0_i32_1 = arith.constant 0 : i32
    return %c0_i32, %c0_i32_0 : i32, i32
  }
  func.func @transform_2(%arg0: i32) -> (i32, i32) {
    %c0_i32 = arith.constant 0 : i32
    %c0_i32_0 = arith.constant 0 : i32
    %c0_i32_1 = arith.constant 0 : i32
    return %c0_i32, %c0_i32_0 : i32, i32
  }
  func.func @transform_3(%arg0: i32) -> (i32, i32) {
    %c0_i32 = arith.constant 0 : i32
    %c0_i32_0 = arith.constant 0 : i32
    return %c0_i32, %arg0 : i32, i32
  }
  func.func @transform_4(%arg0: i32) -> (i32, i32) {
    %c0_i32 = arith.constant 0 : i32
    %c0_i32_0 = arith.constant 0 : i32
    return %c0_i32, %arg0 : i32, i32
  }
  func.func @transform_5(%arg0: i32) -> (i32, i32) {
    %c0_i32 = arith.constant 0 : i32
    %c0_i32_0 = arith.constant 0 : i32
    return %c0_i32, %arg0 : i32, i32
  }
}

</mosaic_0001>

<bundles_post_ra>
// kernel: tpu_custom_call.1
= control target key start
LH: loop header
LB: loop body
LE: loop exit
PB: predicated region body
PF: predicated region fallthrough
CT: control target
= control target key end

     0   :  { %10 = vsyncpa [#allocation3], 0  ;;  %s2216_s0 = inlined_call_operand.vmem [shape: f32[8,1], index: 0, kind: input, shape index: {}]   ;;  %s2217_s1 = inlined_call_operand.vmem [shape: f32[1,64], index: 1, kind: input, shape index: {}]   ;;  %s2218_s2 = inlined_call_operand.vmem [shape: f32[1,64], index: 2, kind: input, shape index: {}]   ;;  %s2219_s3 = inlined_call_operand.hbm [shape: f32[64,4096], index: 3, kind: input, shape index: {}]   ;;  %s2220_s4 = inlined_call_operand.hbm [shape: f32[1,4096], index: 4, kind: input, shape index: {}]   ;;  %s2221_s5 = inlined_call_operand.hbm [shape: f32[8,4096], index: 5, kind: output, shape index: {}]  }
   0x1   :  { %11 = vsyncpa [#allocation6], 0 }
   0x2   :  { %12 = vsyncpa [#allocation4], 0  ;;  %s2036_s18 = smov [#allocation2]   ;;  %s1964_s22 = scalar_lea.hbm %s2219_s3, 32768 }
   0x3   :  { %s24_s19 = sshll.u32 %s2036_s18, 4  ;;  %p1965_p0 = scmp.ne.s32.totalorder %s2219_s3, %s1964_s22  ;;  %s25_s19 = int_to_ptr.vmem [resolvable:$true] %s24_s19 }
   0x4   :  { %p1968_p1 = scmp.lt.u32.totalorder %s1964_s22, %s2219_s3 }
   0x6   :  { %p1970_p2 = pnand %p1968_p1, %p1965_p0 }
   0x8   :  { %1973 = shalt.err (!%p1970_p2)
}
   0x9   :  { %s1974_s27 = scalar_lea.vmem %s25_s19, 32768  ;;  %p1979_p4 = scmp.lt.s32.totalorder %s25_s19, %s25_s19 }
   0xa   :  { %p1975_p3 = scmp.ne.s32.totalorder %s25_s19, %s1974_s27  ;;  %p1980_p5 = scmp.lt.s32.totalorder %s1974_s27, %s1974_s27 }
   0xc   :  { %p1981_p6 = por %p1980_p5, %p1979_p4 }
   0xe   :  { %p1982_p7 = pnand %p1981_p6, %p1975_p3 }
  0x10   :  { %1985 = shalt.err (!%p1982_p7)
}
  0x11   :  { %s2037_s28 = smov 4096   ;;  %s2038_s29 = smov 256  }
  0x12   :  { %30 = dma.hbm_to_vmem [thread:$0]  %s2219_s3, 32768, %s25_s19, [#allocation3], %s2037_s28, %s2037_s28, %s2038_s29  }
  0x13   :  { %s2039_s7 = smov [#allocation5]   ;;  %s1986_s11 = scalar_lea.hbm %s2220_s4, 512 }
  0x14   :  { %s37_s8 = sshll.u32 %s2039_s7, 4  ;;  %p1987_p8 = scmp.ne.s32.totalorder %s2220_s4, %s1986_s11  ;;  %s38_s8 = int_to_ptr.vmem [resolvable:$true] %s37_s8 }
  0x15   :  { %p1990_p9 = scmp.lt.u32.totalorder %s1986_s11, %s2220_s4 }
  0x17   :  { %p1992_p10 = pnand %p1990_p9, %p1987_p8 }
  0x19   :  { %1995 = shalt.err (!%p1992_p10)
}
  0x1a   :  { %s1996_s16 = scalar_lea.vmem %s38_s8, 512  ;;  %p2001_p12 = scmp.lt.s32.totalorder %s38_s8, %s38_s8 }
  0x1b   :  { %p1997_p11 = scmp.ne.s32.totalorder %s38_s8, %s1996_s16  ;;  %p2002_p13 = scmp.lt.s32.totalorder %s1996_s16, %s1996_s16 }
  0x1d   :  { %p2003_p0 = por %p2002_p13, %p2001_p12 }
  0x1f   :  { %p2004_p1 = pnand %p2003_p0, %p1997_p11 }
  0x21   :  { %2007 = shalt.err (!%p2004_p1)
}
  0x22   :  { %40 = dma.hbm_to_vmem [thread:$0]  %s2220_s4, 512, %s38_s8, [#allocation6]  }
  0x23   :  { %2030 = dma.done.wait [#allocation3], 32768  }
  0x24   :  { %2031 = vsyncadd [#allocation3], 4294934528 }
  0x25   :  { %2032 = dma.done.wait [#allocation6], 512  }
  0x26   :  { %2033 = vsyncadd [#allocation6], 4294966784  ;;  %v2040_v0 = vmov 0   ;;  %v47_v1 = vld [vmem:[%s2216_s0] sm:$0xff]  ;;  %v71_v2 = vld [vmem:[#allocation2 + $0x8] sm:$0xff]  ;;  %v2041_v30 = vmov 0.0  }
  0x27   :  { %1963 = vset.pattern.permute.xlu0 %v2040_v0  ;;  %v103_v3 = vld [vmem:[#allocation2 + $0x108] sm:$0xff]  ;;  %v73_v5 = vld [vmem:[#allocation2 + $0x18] sm:$0xff]  ;;  %v70_v7 = vld [vmem:[#allocation2] sm:$0xff]  ;;  %562 = vmatprep.mubr.f32.mxu0 %v2041_v30  ;;  %vm494_vm0 = vcmask 523264  }
  0x28   :  { %51 = vperm.xlu0 %1963, %v47_v1   ;;  %v1700_v4 = vpack.c.bf16 %v103_v3, %v71_v2  ;;  %v105_v6 = vld [vmem:[#allocation2 + $0x118] sm:$0xff]  ;;  %v102_v9 = vld [vmem:[#allocation2 + $0x100] sm:$0xff]  ;;  %v72_v10 = vld [vmem:[#allocation2 + $0x10] sm:$0xff]  ;;  %633 = vmatprep.mubr.f32.mxu1 %v2041_v30 }
  0x29   :  { %v1716_v8 = vpack.c.bf16 %v105_v6, %v73_v5  ;;  %v104_v11 = vld [vmem:[#allocation2 + $0x110] sm:$0xff]  ;;  %v1702_v12 = vpack.c.bf16 %v102_v9, %v70_v7  ;;  %v135_v14 = vld [vmem:[#allocation2 + $0x208] sm:$0xff]  ;;  %v137_v16 = vld [vmem:[#allocation2 + $0x218] sm:$0xff] }
  0x2a   :  { %1701 = vmatprep.subr.bf16.mxu0 %v1700_v4  ;;  %v1718_v13 = vpack.c.bf16 %v104_v11, %v72_v10  ;;  %v167_v15 = vld [vmem:[#allocation2 + $0x308] sm:$0xff]  ;;  %v169_v18 = vld [vmem:[#allocation2 + $0x318] sm:$0xff]  ;;  %v134_v19 = vld [vmem:[#allocation2 + $0x200] sm:$0xff] }
  0x2b   :  { %1717 = vmatprep.subr.bf16.mxu1 %v1716_v8  ;;  %v1704_v17 = vpack.c.bf16 %v167_v15, %v135_v14  ;;  %v166_v20 = vld [vmem:[#allocation2 + $0x300] sm:$0xff]  ;;  %1703 = vmatpush1.bf16.msra.mxu0 %v1702_v12  ;;  %v1720_v21 = vpack.c.bf16 %v169_v18, %v137_v16  ;;  %v136_v23 = vld [vmem:[#allocation2 + $0x210] sm:$0xff]  ;;  %v199_v25 = vld [vmem:[#allocation2 + $0x408] sm:$0xff] }
  0x2c   :  { %1719 = vmatpush1.bf16.msra.mxu1 %v1718_v13  ;;  %v1706_v22 = vpack.c.bf16 %v166_v20, %v134_v19  ;;  %v168_v24 = vld [vmem:[#allocation2 + $0x310] sm:$0xff]  ;;  %v231_v27 = vld [vmem:[#allocation2 + $0x508] sm:$0xff]  ;;  %v201_v28 = vld [vmem:[#allocation2 + $0x418] sm:$0xff] }
  0x2d   :  { %1705 = vmatprep.subr.bf16.mxu0 %v1704_v17  ;;  %v1722_v26 = vpack.c.bf16 %v168_v24, %v136_v23  ;;  %v233_v29 = vld [vmem:[#allocation2 + $0x518] sm:$0xff]  ;;  %1721 = vmatprep.subr.bf16.mxu1 %v1720_v21  ;;  %v1708_v31 = vpack.c.bf16 %v231_v27, %v199_v25  ;;  %v198_v33 = vld [vmem:[#allocation2 + $0x400] sm:$0xff]  ;;  %v200_v35 = vld [vmem:[#allocation2 + $0x410] sm:$0xff] }
  0x2e   :  { %v1724_v32 = vpack.c.bf16 %v233_v29, %v201_v28  ;;  %v230_v34 = vld [vmem:[#allocation2 + $0x500] sm:$0xff]  ;;  %v232_v36 = vld [vmem:[#allocation2 + $0x510] sm:$0xff]  ;;  %v263_v39 = vld [vmem:[#allocation2 + $0x608] sm:$0xff] }
  0x2f   :  { %1707 = vmatpush1.bf16.msra.mxu0 %v1706_v22  ;;  %v1710_v37 = vpack.c.bf16 %v230_v34, %v198_v33  ;;  %v1726_v38 = vpack.c.bf16 %v232_v36, %v200_v35  ;;  %v295_v40 = vld [vmem:[#allocation2 + $0x708] sm:$0xff]  ;;  %v265_v41 = vld [vmem:[#allocation2 + $0x618] sm:$0xff]  ;;  %v262_v44 = vld [vmem:[#allocation2 + $0x600] sm:$0xff] }
  0x30   :  { %1723 = vmatpush1.bf16.msra.mxu1 %v1722_v26  ;;  %1709 = vmatprep.subr.bf16.mxu0 %v1708_v31  ;;  %v1712_v42 = vpack.c.bf16 %v295_v40, %v263_v39  ;;  %v297_v43 = vld [vmem:[#allocation2 + $0x718] sm:$0xff]  ;;  %v294_v45 = vld [vmem:[#allocation2 + $0x700] sm:$0xff]  ;;  %v264_v47 = vld [vmem:[#allocation2 + $0x610] sm:$0xff] }
  0x31   :  { %1725 = vmatprep.subr.bf16.mxu1 %v1724_v32  ;;  %v1728_v46 = vpack.c.bf16 %v297_v43, %v265_v41  ;;  %v296_v48 = vld [vmem:[#allocation2 + $0x710] sm:$0xff]  ;;  %v75_v49 = vld [vmem:[#allocation2 + $0x28] sm:$0xff]  ;;  %v77_v51 = vld [vmem:[#allocation2 + $0x38] sm:$0xff]  ;;  %v1714_v53 = vpack.c.bf16 %v294_v45, %v262_v44 }
  0x32   :  { %v107_v50 = vld [vmem:[#allocation2 + $0x128] sm:$0xff]  ;;  %v109_v52 = vld [vmem:[#allocation2 + $0x138] sm:$0xff]  ;;  %v1730_v54 = vpack.c.bf16 %v296_v48, %v264_v47  ;;  %v1682_v57 = vld [vmem:[%s2217_s1] ss:$0 sm:$0xff]  ;;  %s2042_s1 = smov [#allocation7]  }
  0x33   :  { %1711 = vmatpush1.bf16.msra.mxu0 %v1710_v37  ;;  %v1732_v55 = vpack.c.bf16 %v107_v50, %v75_v49  ;;  %v1748_v56 = vpack.c.bf16 %v109_v52, %v77_v51  ;;  %v1683_v58 = vld [vmem:[%s2218_s2] ss:$0 sm:$0xff]  ;;  %v76_v63 = vld [vmem:[#allocation2 + $0x30] sm:$0xff]  ;;  %v139_v1 = vld [vmem:[#allocation2 + $0x228] sm:$0xff]  ;;  %s1672_s2 = sshll.u32 %s2042_s1, 4  ;;  %s1673_s2 = int_to_ptr.vmem [resolvable:$true] %s1672_s2 }
  0x34   :  { %1727 = vmatpush1.bf16.msra.mxu1 %v1726_v38  ;;  %1713 = vmatprep.subr.bf16.mxu0 %v1712_v42  ;;  %v74_v60 = vld [vmem:[#allocation2 + $0x20] sm:$0xff]  ;;  %v108_v0 = vld [vmem:[#allocation2 + $0x130] sm:$0xff]  ;;  %v171_v2 = vld [vmem:[#allocation2 + $0x328] sm:$0xff]  ;;  %s2008_s22 = scalar_lea.vmem %s1673_s2, 4096  ;;  %p2013_p3 = scmp.lt.s32.totalorder %s1673_s2, %s1673_s2 }
  0x35   :  { %1729 = vmatprep.subr.bf16.mxu1 %v1728_v46  ;;  %v106_v61 = vld [vmem:[#allocation2 + $0x120] sm:$0xff]  ;;  %v141_v3 = vld [vmem:[#allocation2 + $0x238] sm:$0xff]  ;;  %v1750_v7 = vpack.c.bf16 %v108_v0, %v76_v63  ;;  %v1736_v11 = vpack.c.bf16 %v171_v2, %v139_v1  ;;  %v140_v13 = vld [vmem:[#allocation2 + $0x230] sm:$0xff]  ;;  %p2009_p2 = scmp.ne.s32.totalorder %s1673_s2, %s2008_s22  ;;  %p2014_p4 = scmp.lt.s32.totalorder %s2008_s22, %s2008_s22 }
  0x36   :  { %v173_v4 = vld [vmem:[#allocation2 + $0x338] sm:$0xff]  ;;  %v1734_v6 = vpack.c.bf16 %v106_v61, %v74_v60  ;;  %v138_v8 = vld [vmem:[#allocation2 + $0x220] sm:$0xff]  ;;  %v172_v14 = vld [vmem:[#allocation2 + $0x330] sm:$0xff] }
  0x37   :  { %1715 = vmatpush1.bf16.msra.mxu0 %v1714_v53  ;;  %v170_v9 = vld [vmem:[#allocation2 + $0x320] sm:$0xff]  ;;  %v1752_v12 = vpack.c.bf16 %v173_v4, %v141_v3  ;;  %v203_v15 = vld [vmem:[#allocation2 + $0x428] sm:$0xff]  ;;  %v205_v17 = vld [vmem:[#allocation2 + $0x438] sm:$0xff]  ;;  %v1754_v20 = vpack.c.bf16 %v172_v14, %v140_v13  ;;  %p2015_p5 = por %p2014_p4, %p2013_p3 }
  0x38   :  { %1731 = vmatpush1.bf16.msra.mxu1 %v1730_v54  ;;  %1733 = vmatprep.subr.bf16.mxu0 %v1732_v55  ;;  %v235_v16 = vld [vmem:[#allocation2 + $0x528] sm:$0xff]  ;;  %v237_v18 = vld [vmem:[#allocation2 + $0x538] sm:$0xff]  ;;  %v1738_v19 = vpack.c.bf16 %v170_v9, %v138_v8  ;;  %v202_v21 = vld [vmem:[#allocation2 + $0x420] sm:$0xff] }
  0x39   :  { %1749 = vmatprep.subr.bf16.mxu1 %v1748_v56  ;;  %v234_v22 = vld [vmem:[#allocation2 + $0x520] sm:$0xff]  ;;  %v1740_v23 = vpack.c.bf16 %v235_v16, %v203_v15  ;;  %v1756_v24 = vpack.c.bf16 %v237_v18, %v205_v17  ;;  %v204_v25 = vld [vmem:[#allocation2 + $0x430] sm:$0xff]  ;;  %v267_v27 = vld [vmem:[#allocation2 + $0x628] sm:$0xff]  ;;  %p2016_p6 = pnand %p2015_p5, %p2009_p2 }
  0x3a   :  { %v236_v26 = vld [vmem:[#allocation2 + $0x530] sm:$0xff]  ;;  %v299_v28 = vld [vmem:[#allocation2 + $0x728] sm:$0xff]  ;;  %v269_v29 = vld [vmem:[#allocation2 + $0x638] sm:$0xff]  ;;  %v1742_v32 = vpack.c.bf16 %v234_v22, %v202_v21 }
  0x3b   :  { %v301_v31 = vld [vmem:[#allocation2 + $0x738] sm:$0xff]  ;;  %v1758_v33 = vpack.c.bf16 %v236_v26, %v204_v25  ;;  %v266_v34 = vld [vmem:[#allocation2 + $0x620] sm:$0xff]  ;;  %v1744_v36 = vpack.c.bf16 %v299_v28, %v267_v27  ;;  %v268_v38 = vld [vmem:[#allocation2 + $0x630] sm:$0xff] }
  0x3c   :  { %v298_v35 = vld [vmem:[#allocation2 + $0x720] sm:$0xff]  ;;  %v1760_v37 = vpack.c.bf16 %v301_v31, %v269_v29  ;;  %v300_v39 = vld [vmem:[#allocation2 + $0x730] sm:$0xff]  ;;  %v79_v40 = vld [vmem:[#allocation2 + $0x48] sm:$0xff] }
  0x3d   :  { %v111_v41 = vld [vmem:[#allocation2 + $0x148] sm:$0xff]  ;;  %v81_v42 = vld [vmem:[#allocation2 + $0x58] sm:$0xff]  ;;  %v1746_v44 = vpack.c.bf16 %v298_v35, %v266_v34  ;;  %v1762_v45 = vpack.c.bf16 %v300_v39, %v268_v38  ;;  %v78_v46 = vld [vmem:[#allocation2 + $0x40] sm:$0xff] }
  0x3e   :  { %v113_v43 = vld [vmem:[#allocation2 + $0x158] sm:$0xff]  ;;  %v110_v47 = vld [vmem:[#allocation2 + $0x140] sm:$0xff]  ;;  %v1764_v48 = vpack.c.bf16 %v111_v41, %v79_v40  ;;  %v80_v50 = vld [vmem:[#allocation2 + $0x50] sm:$0xff] }
  0x3f   :  { %v1780_v49 = vpack.c.bf16 %v113_v43, %v81_v42  ;;  %v112_v51 = vld [vmem:[#allocation2 + $0x150] sm:$0xff]  ;;  %v143_v52 = vld [vmem:[#allocation2 + $0x248] sm:$0xff]  ;;  %v145_v54 = vld [vmem:[#allocation2 + $0x258] sm:$0xff]  ;;  %v1766_v56 = vpack.c.bf16 %v110_v47, %v78_v46 }
  0x40   :  { %v175_v53 = vld [vmem:[#allocation2 + $0x348] sm:$0xff]  ;;  %v177_v55 = vld [vmem:[#allocation2 + $0x358] sm:$0xff]  ;;  %v176_v63 = vld [vmem:[#allocation2 + $0x350] sm:$0xff] }
  0x41   :  { %v1768_v60 = vpack.c.bf16 %v175_v53, %v143_v52  ;;  %v1784_v61 = vpack.c.bf16 %v177_v55, %v145_v54  ;;  %v207_v0 = vld [vmem:[#allocation2 + $0x448] sm:$0xff]  ;;  %v209_v2 = vld [vmem:[#allocation2 + $0x458] sm:$0xff] }
  0x42   :  { %v239_v1 = vld [vmem:[#allocation2 + $0x548] sm:$0xff]  ;;  %v241_v3 = vld [vmem:[#allocation2 + $0x558] sm:$0xff] }
  0x43   :  { %v1772_v8 = vpack.c.bf16 %v239_v1, %v207_v0  ;;  %v1788_v9 = vpack.c.bf16 %v241_v3, %v209_v2  ;;  %v271_v13 = vld [vmem:[#allocation2 + $0x648] sm:$0xff]  ;;  %v273_v15 = vld [vmem:[#allocation2 + $0x658] sm:$0xff] }
  0x44   :  { %v303_v14 = vld [vmem:[#allocation2 + $0x748] sm:$0xff]  ;;  %v305_v16 = vld [vmem:[#allocation2 + $0x758] sm:$0xff] }
  0x45   :  { %v1776_v21 = vpack.c.bf16 %v303_v14, %v271_v13  ;;  %v1792_v22 = vpack.c.bf16 %v305_v16, %v273_v15  ;;  %v83_v25 = vld [vmem:[#allocation2 + $0x68] sm:$0xff]  ;;  %v85_v27 = vld [vmem:[#allocation2 + $0x78] sm:$0xff] }
  0x46   :  { %v115_v26 = vld [vmem:[#allocation2 + $0x168] sm:$0xff]  ;;  %v117_v28 = vld [vmem:[#allocation2 + $0x178] sm:$0xff] }
  0x47   :  { %v1796_v34 = vpack.c.bf16 %v115_v26, %v83_v25  ;;  %v1812_v35 = vpack.c.bf16 %v117_v28, %v85_v27  ;;  %v147_v38 = vld [vmem:[#allocation2 + $0x268] sm:$0xff]  ;;  %v149_v40 = vld [vmem:[#allocation2 + $0x278] sm:$0xff] }
  0x48   :  { %v179_v39 = vld [vmem:[#allocation2 + $0x368] sm:$0xff]  ;;  %v181_v41 = vld [vmem:[#allocation2 + $0x378] sm:$0xff] }
  0x49   :  { %v1800_v46 = vpack.c.bf16 %v179_v39, %v147_v38  ;;  %v1816_v47 = vpack.c.bf16 %v181_v41, %v149_v40  ;;  %v213_v52 = vld [vmem:[#allocation2 + $0x478] sm:$0xff] }
  0x4a   :  { %v245_v53 = vld [vmem:[#allocation2 + $0x578] sm:$0xff] }
  0x4b   :  { %v277_v0 = vld [vmem:[#allocation2 + $0x678] sm:$0xff] }
  0x4c   :  { %v309_v1 = vld [vmem:[#allocation2 + $0x778] sm:$0xff] }
  0x4d   :  { %v89_v13 = vld [vmem:[#allocation2 + $0x98] sm:$0xff] }
  0x4e   :  { %v121_v14 = vld [vmem:[#allocation2 + $0x198] sm:$0xff] }
  0x4f   :  { %v153_v25 = vld [vmem:[#allocation2 + $0x298] sm:$0xff] }
  0x50   :  { %v185_v26 = vld [vmem:[#allocation2 + $0x398] sm:$0xff] }
  0x51   :  { %v217_v38 = vld [vmem:[#allocation2 + $0x498] sm:$0xff] }
  0x52   :  { %v249_v39 = vld [vmem:[#allocation2 + $0x598] sm:$0xff] }
  0xa7   :  { %v52_v59 = vpop.permute.xlu0 %51 }
  0xa8   :  { %v60_v62 = vmul.f32 %v1682_v57, %v52_v59  ;;  %v1782_v57 = vpack.c.bf16 %v112_v51, %v80_v50  ;;  %v174_v59 = vld [vmem:[#allocation2 + $0x340] sm:$0xff]  ;;  %v211_v50 = vld [vmem:[#allocation2 + $0x468] sm:$0xff] }
  0xa9   :  { %v243_v51 = vld [vmem:[#allocation2 + $0x568] sm:$0xff] }
  0xaa   :  { %v68_v5 = vadd.f32 %v1683_v58, %v60_v62  ;;  %v142_v58 = vld [vmem:[#allocation2 + $0x240] sm:$0xff]  ;;  %v144_v62 = vld [vmem:[#allocation2 + $0x250] sm:$0xff] }
  0xab   :  { %v1770_v4 = vpack.c.bf16 %v174_v59, %v142_v58  ;;  %v1804_v58 = vpack.c.bf16 %v243_v51, %v211_v50  ;;  %v1820_v59 = vpack.c.bf16 %v245_v53, %v213_v52  ;;  %v281_v50 = vld [vmem:[#allocation2 + $0x698] sm:$0xff] }
  0xac   :  { %v2108_v10 = vmax.f32 %v68_v5, 0.0  ;;  %v1786_v5 = vpack.c.bf16 %v176_v63, %v144_v62  ;;  %v275_v62 = vld [vmem:[#allocation2 + $0x668] sm:$0xff]  ;;  %v313_v51 = vld [vmem:[#allocation2 + $0x798] sm:$0xff] }
  0xad   :  { %v307_v63 = vld [vmem:[#allocation2 + $0x768] sm:$0xff] }
  0xae   :  { %1684 = vmatmul.mubr.msk.f32.vlgmr.msra.gmra.mrb[0].mxu0 %vm494_vm0, %v2108_v10  ;;  %1685 = vmatmul.mubr.msk.f32.vlgmr.msra.gmra.mrb[0].mxu1 %vm494_vm0, %v2108_v10 }
  0xaf   :  { %1735 = vmatpush1.bf16.msra.mxu0 %v1734_v6  ;;  %1751 = vmatpush1.bf16.msra.mxu1 %v1750_v7  ;;  %v206_v6 = vld [vmem:[#allocation2 + $0x440] sm:$0xff] }
  0xb0   :  { %1737 = vmatprep.subr.bf16.mxu0 %v1736_v11  ;;  %1753 = vmatprep.subr.bf16.mxu1 %v1752_v12  ;;  %v238_v7 = vld [vmem:[#allocation2 + $0x540] sm:$0xff]  ;;  %v208_v11 = vld [vmem:[#allocation2 + $0x450] sm:$0xff] }
  0xb1   :  { %704 = vmatprep.mubr.f32.mxu0 %v2041_v30  ;;  %775 = vmatprep.mubr.f32.mxu1 %v2041_v30  ;;  %v240_v12 = vld [vmem:[#allocation2 + $0x550] sm:$0xff]  ;;  %v1774_v17 = vpack.c.bf16 %v238_v7, %v206_v6  ;;  %v1808_v6 = vpack.c.bf16 %v307_v63, %v275_v62  ;;  %v1824_v7 = vpack.c.bf16 %v309_v1, %v277_v0  ;;  %v93_v62 = vld [vmem:[#allocation2 + $0xb8] sm:$0xff] }
  0xb2   :  { %v1790_v18 = vpack.c.bf16 %v240_v12, %v208_v11  ;;  %v87_v11 = vld [vmem:[#allocation2 + $0x88] sm:$0xff]  ;;  %v125_v63 = vld [vmem:[#allocation2 + $0x1b8] sm:$0xff] }
  0xb3   :  { %1739 = vmatpush1.bf16.msra.mxu0 %v1738_v19  ;;  %1755 = vmatpush1.bf16.msra.mxu1 %v1754_v20  ;;  %v270_v19 = vld [vmem:[#allocation2 + $0x640] sm:$0xff]  ;;  %v119_v12 = vld [vmem:[#allocation2 + $0x188] sm:$0xff] }
  0xb4   :  { %1741 = vmatprep.subr.bf16.mxu0 %v1740_v23  ;;  %1757 = vmatprep.subr.bf16.mxu1 %v1756_v24  ;;  %v302_v20 = vld [vmem:[#allocation2 + $0x740] sm:$0xff]  ;;  %v272_v23 = vld [vmem:[#allocation2 + $0x650] sm:$0xff] }
  0xb5   :  { %v304_v24 = vld [vmem:[#allocation2 + $0x750] sm:$0xff]  ;;  %v1778_v29 = vpack.c.bf16 %v302_v20, %v270_v19  ;;  %v1828_v19 = vpack.c.bf16 %v119_v12, %v87_v11  ;;  %v1844_v20 = vpack.c.bf16 %v121_v14, %v89_v13  ;;  %v157_v11 = vld [vmem:[#allocation2 + $0x2b8] sm:$0xff] }
  0xb6   :  { %v1794_v31 = vpack.c.bf16 %v304_v24, %v272_v23  ;;  %v151_v23 = vld [vmem:[#allocation2 + $0x288] sm:$0xff]  ;;  %v189_v12 = vld [vmem:[#allocation2 + $0x3b8] sm:$0xff] }
  0xb7   :  { %1743 = vmatpush1.bf16.msra.mxu0 %v1742_v32  ;;  %1759 = vmatpush1.bf16.msra.mxu1 %v1758_v33  ;;  %v82_v32 = vld [vmem:[#allocation2 + $0x60] sm:$0xff]  ;;  %v183_v24 = vld [vmem:[#allocation2 + $0x388] sm:$0xff] }
  0xb8   :  { %1745 = vmatprep.subr.bf16.mxu0 %v1744_v36  ;;  %1761 = vmatprep.subr.bf16.mxu1 %v1760_v37  ;;  %v114_v33 = vld [vmem:[#allocation2 + $0x160] sm:$0xff]  ;;  %v84_v36 = vld [vmem:[#allocation2 + $0x70] sm:$0xff] }
  0xb9   :  { %v116_v37 = vld [vmem:[#allocation2 + $0x170] sm:$0xff]  ;;  %v1798_v42 = vpack.c.bf16 %v114_v33, %v82_v32  ;;  %v1832_v32 = vpack.c.bf16 %v183_v24, %v151_v23  ;;  %v1848_v33 = vpack.c.bf16 %v185_v26, %v153_v25  ;;  %v221_v23 = vld [vmem:[#allocation2 + $0x4b8] sm:$0xff] }
  0xba   :  { %v1814_v43 = vpack.c.bf16 %v116_v37, %v84_v36  ;;  %v215_v36 = vld [vmem:[#allocation2 + $0x488] sm:$0xff]  ;;  %v253_v24 = vld [vmem:[#allocation2 + $0x5b8] sm:$0xff] }
  0xbb   :  { %1747 = vmatpush1.bf16.msra.mxu0 %v1746_v44  ;;  %1763 = vmatpush1.bf16.msra.mxu1 %v1762_v45  ;;  %v146_v44 = vld [vmem:[#allocation2 + $0x260] sm:$0xff]  ;;  %v247_v37 = vld [vmem:[#allocation2 + $0x588] sm:$0xff] }
  0xbc   :  { %1765 = vmatprep.subr.bf16.mxu0 %v1764_v48  ;;  %1781 = vmatprep.subr.bf16.mxu1 %v1780_v49  ;;  %v178_v45 = vld [vmem:[#allocation2 + $0x360] sm:$0xff]  ;;  %v148_v48 = vld [vmem:[#allocation2 + $0x270] sm:$0xff] }
  0xbd   :  { %v180_v49 = vld [vmem:[#allocation2 + $0x370] sm:$0xff]  ;;  %v1802_v54 = vpack.c.bf16 %v178_v45, %v146_v44  ;;  %v1836_v44 = vpack.c.bf16 %v247_v37, %v215_v36  ;;  %v1852_v45 = vpack.c.bf16 %v249_v39, %v217_v38  ;;  %v285_v36 = vld [vmem:[#allocation2 + $0x6b8] sm:$0xff] }
  0xbe   :  { %1686 = vmatmul.mubr.msk.f32.vlgmr.msra.gmra.mrb[2].mxu0 %vm494_vm0, %v2108_v10  ;;  %1687 = vmatmul.mubr.msk.f32.vlgmr.msra.gmra.mrb[2].mxu1 %vm494_vm0, %v2108_v10  ;;  %v1818_v55 = vpack.c.bf16 %v180_v49, %v148_v48  ;;  %v279_v48 = vld [vmem:[#allocation2 + $0x688] sm:$0xff]  ;;  %v317_v37 = vld [vmem:[#allocation2 + $0x7b8] sm:$0xff] }
  0xbf   :  { %1767 = vmatpush1.bf16.msra.mxu0 %v1766_v56  ;;  %1783 = vmatpush1.bf16.msra.mxu1 %v1782_v57  ;;  %v210_v56 = vld [vmem:[#allocation2 + $0x460] sm:$0xff]  ;;  %v311_v49 = vld [vmem:[#allocation2 + $0x788] sm:$0xff] }
  0xc0   :  { %1769 = vmatprep.subr.bf16.mxu0 %v1768_v60  ;;  %1785 = vmatprep.subr.bf16.mxu1 %v1784_v61  ;;  %v242_v57 = vld [vmem:[#allocation2 + $0x560] sm:$0xff]  ;;  %v212_v60 = vld [vmem:[#allocation2 + $0x470] sm:$0xff] }
  0xc1   :  { %846 = vmatprep.mubr.f32.mxu0 %v2041_v30  ;;  %917 = vmatprep.mubr.f32.mxu1 %v2041_v30  ;;  %v244_v61 = vld [vmem:[#allocation2 + $0x570] sm:$0xff]  ;;  %v1806_v2 = vpack.c.bf16 %v242_v57, %v210_v56  ;;  %v1840_v56 = vpack.c.bf16 %v311_v49, %v279_v48  ;;  %v1856_v57 = vpack.c.bf16 %v313_v51, %v281_v50  ;;  %v97_v48 = vld [vmem:[#allocation2 + $0xd8] sm:$0xff] }
  0xc2   :  { %v1822_v3 = vpack.c.bf16 %v244_v61, %v212_v60  ;;  %v91_v60 = vld [vmem:[#allocation2 + $0xa8] sm:$0xff]  ;;  %v129_v49 = vld [vmem:[#allocation2 + $0x1d8] sm:$0xff] }
  0xc3   :  { %1771 = vmatpush1.bf16.msra.mxu0 %v1770_v4  ;;  %1787 = vmatpush1.bf16.msra.mxu1 %v1786_v5  ;;  %v274_v4 = vld [vmem:[#allocation2 + $0x660] sm:$0xff]  ;;  %v123_v61 = vld [vmem:[#allocation2 + $0x1a8] sm:$0xff] }
  0xc4   :  { %1773 = vmatprep.subr.bf16.mxu0 %v1772_v8  ;;  %1789 = vmatprep.subr.bf16.mxu1 %v1788_v9  ;;  %v306_v5 = vld [vmem:[#allocation2 + $0x760] sm:$0xff]  ;;  %v276_v8 = vld [vmem:[#allocation2 + $0x670] sm:$0xff] }
  0xc5   :  { %v308_v9 = vld [vmem:[#allocation2 + $0x770] sm:$0xff]  ;;  %v1810_v15 = vpack.c.bf16 %v306_v5, %v274_v4  ;;  %v1860_v4 = vpack.c.bf16 %v123_v61, %v91_v60  ;;  %v1876_v5 = vpack.c.bf16 %v125_v63, %v93_v62  ;;  %v161_v60 = vld [vmem:[#allocation2 + $0x2d8] sm:$0xff] }
  0xc6   :  { %v1826_v16 = vpack.c.bf16 %v308_v9, %v276_v8  ;;  %v155_v8 = vld [vmem:[#allocation2 + $0x2a8] sm:$0xff]  ;;  %v193_v61 = vld [vmem:[#allocation2 + $0x3d8] sm:$0xff] }
  0xc7   :  { %1775 = vmatpush1.bf16.msra.mxu0 %v1774_v17  ;;  %1791 = vmatpush1.bf16.msra.mxu1 %v1790_v18  ;;  %v86_v17 = vld [vmem:[#allocation2 + $0x80] sm:$0xff]  ;;  %v187_v9 = vld [vmem:[#allocation2 + $0x3a8] sm:$0xff] }
  0xc8   :  { %1777 = vmatprep.subr.bf16.mxu0 %v1776_v21  ;;  %1793 = vmatprep.subr.bf16.mxu1 %v1792_v22  ;;  %v118_v18 = vld [vmem:[#allocation2 + $0x180] sm:$0xff]  ;;  %v88_v21 = vld [vmem:[#allocation2 + $0x90] sm:$0xff] }
  0xc9   :  { %v120_v22 = vld [vmem:[#allocation2 + $0x190] sm:$0xff]  ;;  %v1830_v27 = vpack.c.bf16 %v118_v18, %v86_v17  ;;  %v1864_v17 = vpack.c.bf16 %v187_v9, %v155_v8  ;;  %v1880_v18 = vpack.c.bf16 %v189_v12, %v157_v11  ;;  %v225_v8 = vld [vmem:[#allocation2 + $0x4d8] sm:$0xff] }
  0xca   :  { %v1846_v28 = vpack.c.bf16 %v120_v22, %v88_v21  ;;  %v219_v21 = vld [vmem:[#allocation2 + $0x4a8] sm:$0xff]  ;;  %v257_v9 = vld [vmem:[#allocation2 + $0x5d8] sm:$0xff] }
  0xcb   :  { %1779 = vmatpush1.bf16.msra.mxu0 %v1778_v29  ;;  %1795 = vmatpush1.bf16.msra.mxu1 %v1794_v31  ;;  %v150_v29 = vld [vmem:[#allocation2 + $0x280] sm:$0xff]  ;;  %v251_v22 = vld [vmem:[#allocation2 + $0x5a8] sm:$0xff] }
  0xcc   :  { %1797 = vmatprep.subr.bf16.mxu0 %v1796_v34  ;;  %1813 = vmatprep.subr.bf16.mxu1 %v1812_v35  ;;  %v182_v31 = vld [vmem:[#allocation2 + $0x380] sm:$0xff]  ;;  %v152_v34 = vld [vmem:[#allocation2 + $0x290] sm:$0xff] }
  0xcd   :  { %v184_v35 = vld [vmem:[#allocation2 + $0x390] sm:$0xff]  ;;  %v1834_v40 = vpack.c.bf16 %v182_v31, %v150_v29  ;;  %v1868_v29 = vpack.c.bf16 %v251_v22, %v219_v21  ;;  %v1884_v31 = vpack.c.bf16 %v253_v24, %v221_v23  ;;  %v289_v21 = vld [vmem:[#allocation2 + $0x6d8] sm:$0xff] }
  0xce   :  { %1688 = vmatmul.mubr.msk.f32.vlgmr.msra.gmra.mrb[4].mxu0 %vm494_vm0, %v2108_v10  ;;  %1689 = vmatmul.mubr.msk.f32.vlgmr.msra.gmra.mrb[4].mxu1 %vm494_vm0, %v2108_v10  ;;  %v1850_v41 = vpack.c.bf16 %v184_v35, %v152_v34  ;;  %v283_v34 = vld [vmem:[#allocation2 + $0x6a8] sm:$0xff]  ;;  %v321_v22 = vld [vmem:[#allocation2 + $0x7d8] sm:$0xff] }
  0xcf   :  { %1799 = vmatpush1.bf16.msra.mxu0 %v1798_v42  ;;  %1815 = vmatpush1.bf16.msra.mxu1 %v1814_v43  ;;  %v214_v42 = vld [vmem:[#allocation2 + $0x480] sm:$0xff]  ;;  %v315_v35 = vld [vmem:[#allocation2 + $0x7a8] sm:$0xff] }
  0xd0   :  { %1801 = vmatprep.subr.bf16.mxu0 %v1800_v46  ;;  %1817 = vmatprep.subr.bf16.mxu1 %v1816_v47  ;;  %v246_v43 = vld [vmem:[#allocation2 + $0x580] sm:$0xff]  ;;  %v216_v46 = vld [vmem:[#allocation2 + $0x490] sm:$0xff] }
  0xd1   :  { %988 = vmatprep.mubr.f32.mxu0 %v2041_v30  ;;  %1059 = vmatprep.mubr.f32.mxu1 %v2041_v30  ;;  %v248_v47 = vld [vmem:[#allocation2 + $0x590] sm:$0xff]  ;;  %v1838_v52 = vpack.c.bf16 %v246_v43, %v214_v42  ;;  %v1872_v42 = vpack.c.bf16 %v315_v35, %v283_v34  ;;  %v1888_v43 = vpack.c.bf16 %v317_v37, %v285_v36  ;;  %v101_v34 = vld [vmem:[#allocation2 + $0xf8] sm:$0xff] }
  0xd2   :  { %v1854_v53 = vpack.c.bf16 %v248_v47, %v216_v46  ;;  %v95_v46 = vld [vmem:[#allocation2 + $0xc8] sm:$0xff]  ;;  %v133_v35 = vld [vmem:[#allocation2 + $0x1f8] sm:$0xff] }
  0xd3   :  { %1803 = vmatpush1.bf16.msra.mxu0 %v1802_v54  ;;  %1819 = vmatpush1.bf16.msra.mxu1 %v1818_v55  ;;  %v278_v54 = vld [vmem:[#allocation2 + $0x680] sm:$0xff]  ;;  %v127_v47 = vld [vmem:[#allocation2 + $0x1c8] sm:$0xff] }
  0xd4   :  { %1805 = vmatprep.subr.bf16.mxu0 %v1804_v58  ;;  %1821 = vmatprep.subr.bf16.mxu1 %v1820_v59  ;;  %v310_v55 = vld [vmem:[#allocation2 + $0x780] sm:$0xff]  ;;  %v280_v58 = vld [vmem:[#allocation2 + $0x690] sm:$0xff] }
  0xd5   :  { %v312_v59 = vld [vmem:[#allocation2 + $0x790] sm:$0xff]  ;;  %v1842_v0 = vpack.c.bf16 %v310_v55, %v278_v54  ;;  %v1892_v54 = vpack.c.bf16 %v127_v47, %v95_v46  ;;  %v1908_v55 = vpack.c.bf16 %v129_v49, %v97_v48  ;;  %v165_v46 = vld [vmem:[#allocation2 + $0x2f8] sm:$0xff] }
  0xd6   :  { %v1858_v1 = vpack.c.bf16 %v312_v59, %v280_v58  ;;  %v159_v58 = vld [vmem:[#allocation2 + $0x2c8] sm:$0xff]  ;;  %v197_v47 = vld [vmem:[#allocation2 + $0x3f8] sm:$0xff] }
  0xd7   :  { %1807 = vmatpush1.bf16.msra.mxu0 %v1806_v2  ;;  %1823 = vmatpush1.bf16.msra.mxu1 %v1822_v3  ;;  %v90_v2 = vld [vmem:[#allocation2 + $0xa0] sm:$0xff]  ;;  %v191_v59 = vld [vmem:[#allocation2 + $0x3c8] sm:$0xff] }
  0xd8   :  { %1809 = vmatprep.subr.bf16.mxu0 %v1808_v6  ;;  %1825 = vmatprep.subr.bf16.mxu1 %v1824_v7  ;;  %v122_v3 = vld [vmem:[#allocation2 + $0x1a0] sm:$0xff]  ;;  %v92_v6 = vld [vmem:[#allocation2 + $0xb0] sm:$0xff] }
  0xd9   :  { %v124_v7 = vld [vmem:[#allocation2 + $0x1b0] sm:$0xff]  ;;  %v1862_v13 = vpack.c.bf16 %v122_v3, %v90_v2  ;;  %v1896_v2 = vpack.c.bf16 %v191_v59, %v159_v58  ;;  %v1912_v3 = vpack.c.bf16 %v193_v61, %v161_v60  ;;  %v229_v58 = vld [vmem:[#allocation2 + $0x4f8] sm:$0xff] }
  0xda   :  { %v1878_v14 = vpack.c.bf16 %v124_v7, %v92_v6  ;;  %v223_v6 = vld [vmem:[#allocation2 + $0x4c8] sm:$0xff]  ;;  %v261_v59 = vld [vmem:[#allocation2 + $0x5f8] sm:$0xff] }
  0xdb   :  { %1811 = vmatpush1.bf16.msra.mxu0 %v1810_v15  ;;  %1827 = vmatpush1.bf16.msra.mxu1 %v1826_v16  ;;  %v154_v15 = vld [vmem:[#allocation2 + $0x2a0] sm:$0xff]  ;;  %v255_v7 = vld [vmem:[#allocation2 + $0x5c8] sm:$0xff] }
  0xdc   :  { %1829 = vmatprep.subr.bf16.mxu0 %v1828_v19  ;;  %1845 = vmatprep.subr.bf16.mxu1 %v1844_v20  ;;  %v186_v16 = vld [vmem:[#allocation2 + $0x3a0] sm:$0xff]  ;;  %v156_v19 = vld [vmem:[#allocation2 + $0x2b0] sm:$0xff] }
  0xdd   :  { %v188_v20 = vld [vmem:[#allocation2 + $0x3b0] sm:$0xff]  ;;  %v1866_v25 = vpack.c.bf16 %v186_v16, %v154_v15  ;;  %v1900_v15 = vpack.c.bf16 %v255_v7, %v223_v6  ;;  %v1916_v16 = vpack.c.bf16 %v257_v9, %v225_v8  ;;  %v293_v6 = vld [vmem:[#allocation2 + $0x6f8] sm:$0xff] }
  0xde   :  { %1690 = vmatmul.mubr.msk.f32.vlgmr.msra.gmra.mrb[6].mxu0 %vm494_vm0, %v2108_v10  ;;  %1691 = vmatmul.mubr.msk.f32.vlgmr.msra.gmra.mrb[6].mxu1 %vm494_vm0, %v2108_v10  ;;  %v1882_v26 = vpack.c.bf16 %v188_v20, %v156_v19  ;;  %v287_v19 = vld [vmem:[#allocation2 + $0x6c8] sm:$0xff]  ;;  %v325_v7 = vld [vmem:[#allocation2 + $0x7f8] sm:$0xff] }
  0xdf   :  { %1831 = vmatpush1.bf16.msra.mxu0 %v1830_v27  ;;  %1847 = vmatpush1.bf16.msra.mxu1 %v1846_v28  ;;  %v218_v27 = vld [vmem:[#allocation2 + $0x4a0] sm:$0xff]  ;;  %v319_v20 = vld [vmem:[#allocation2 + $0x7c8] sm:$0xff] }
  0xe0   :  { %1833 = vmatprep.subr.bf16.mxu0 %v1832_v32  ;;  %1849 = vmatprep.subr.bf16.mxu1 %v1848_v33  ;;  %v250_v28 = vld [vmem:[#allocation2 + $0x5a0] sm:$0xff]  ;;  %v220_v32 = vld [vmem:[#allocation2 + $0x4b0] sm:$0xff] }
  0xe1   :  { %1130 = vmatprep.mubr.f32.mxu0 %v2041_v30  ;;  %1201 = vmatprep.mubr.f32.mxu1 %v2041_v30  ;;  %v252_v33 = vld [vmem:[#allocation2 + $0x5b0] sm:$0xff]  ;;  %v1870_v38 = vpack.c.bf16 %v250_v28, %v218_v27  ;;  %v1904_v27 = vpack.c.bf16 %v319_v20, %v287_v19  ;;  %v1920_v28 = vpack.c.bf16 %v321_v22, %v289_v21  ;;  %v326_v22 = vld [vmem:[#allocation5] sm:$0xff] }
  0xe2   :  { %v1886_v39 = vpack.c.bf16 %v252_v33, %v220_v32  ;;  %v99_v32 = vld [vmem:[#allocation2 + $0xe8] sm:$0xff] }
  0xe3   :  { %1835 = vmatpush1.bf16.msra.mxu0 %v1834_v40  ;;  %1851 = vmatpush1.bf16.msra.mxu1 %v1850_v41  ;;  %v282_v40 = vld [vmem:[#allocation2 + $0x6a0] sm:$0xff]  ;;  %v131_v33 = vld [vmem:[#allocation2 + $0x1e8] sm:$0xff] }
  0xe4   :  { %1837 = vmatprep.subr.bf16.mxu0 %v1836_v44  ;;  %1853 = vmatprep.subr.bf16.mxu1 %v1852_v45  ;;  %v314_v41 = vld [vmem:[#allocation2 + $0x7a0] sm:$0xff]  ;;  %v284_v44 = vld [vmem:[#allocation2 + $0x6b0] sm:$0xff] }
  0xe5   :  { %v316_v45 = vld [vmem:[#allocation2 + $0x7b0] sm:$0xff]  ;;  %v1874_v50 = vpack.c.bf16 %v314_v41, %v282_v40  ;;  %v1924_v40 = vpack.c.bf16 %v131_v33, %v99_v32  ;;  %v1940_v41 = vpack.c.bf16 %v133_v35, %v101_v34 }
  0xe6   :  { %v1890_v51 = vpack.c.bf16 %v316_v45, %v284_v44  ;;  %v163_v44 = vld [vmem:[#allocation2 + $0x2e8] sm:$0xff] }
  0xe7   :  { %1839 = vmatpush1.bf16.msra.mxu0 %v1838_v52  ;;  %1855 = vmatpush1.bf16.msra.mxu1 %v1854_v53  ;;  %v94_v52 = vld [vmem:[#allocation2 + $0xc0] sm:$0xff]  ;;  %v195_v45 = vld [vmem:[#allocation2 + $0x3e8] sm:$0xff] }
  0xe8   :  { %1841 = vmatprep.subr.bf16.mxu0 %v1840_v56  ;;  %1857 = vmatprep.subr.bf16.mxu1 %v1856_v57  ;;  %v126_v53 = vld [vmem:[#allocation2 + $0x1c0] sm:$0xff]  ;;  %v96_v56 = vld [vmem:[#allocation2 + $0xd0] sm:$0xff] }
  0xe9   :  { %v128_v57 = vld [vmem:[#allocation2 + $0x1d0] sm:$0xff]  ;;  %v1894_v62 = vpack.c.bf16 %v126_v53, %v94_v52  ;;  %v1928_v52 = vpack.c.bf16 %v195_v45, %v163_v44  ;;  %v1944_v53 = vpack.c.bf16 %v197_v47, %v165_v46 }
  0xea   :  { %v1910_v63 = vpack.c.bf16 %v128_v57, %v96_v56  ;;  %v227_v56 = vld [vmem:[#allocation2 + $0x4e8] sm:$0xff] }
  0xeb   :  { %1843 = vmatpush1.bf16.msra.mxu0 %v1842_v0  ;;  %1859 = vmatpush1.bf16.msra.mxu1 %v1858_v1  ;;  %v158_v0 = vld [vmem:[#allocation2 + $0x2c0] sm:$0xff]  ;;  %v259_v57 = vld [vmem:[#allocation2 + $0x5e8] sm:$0xff] }
  0xec   :  { %1861 = vmatprep.subr.bf16.mxu0 %v1860_v4  ;;  %1877 = vmatprep.subr.bf16.mxu1 %v1876_v5  ;;  %v190_v1 = vld [vmem:[#allocation2 + $0x3c0] sm:$0xff]  ;;  %v160_v4 = vld [vmem:[#allocation2 + $0x2d0] sm:$0xff] }
  0xed   :  { %v192_v5 = vld [vmem:[#allocation2 + $0x3d0] sm:$0xff]  ;;  %v1898_v11 = vpack.c.bf16 %v190_v1, %v158_v0  ;;  %v1932_v0 = vpack.c.bf16 %v259_v57, %v227_v56  ;;  %v1948_v1 = vpack.c.bf16 %v261_v59, %v229_v58 }
  0xee   :  { %1692 = vmatmul.mubr.msk.f32.vlgmr.msra.gmra.mrb[8].mxu0 %vm494_vm0, %v2108_v10  ;;  %1693 = vmatmul.mubr.msk.f32.vlgmr.msra.gmra.mrb[8].mxu1 %vm494_vm0, %v2108_v10  ;;  %v1914_v12 = vpack.c.bf16 %v192_v5, %v160_v4  ;;  %v291_v4 = vld [vmem:[#allocation2 + $0x6e8] sm:$0xff] }
  0xef   :  { %1863 = vmatpush1.bf16.msra.mxu0 %v1862_v13  ;;  %1879 = vmatpush1.bf16.msra.mxu1 %v1878_v14  ;;  %v222_v13 = vld [vmem:[#allocation2 + $0x4c0] sm:$0xff]  ;;  %v323_v5 = vld [vmem:[#allocation2 + $0x7e8] sm:$0xff] }
  0xf0   :  { %1865 = vmatprep.subr.bf16.mxu0 %v1864_v17  ;;  %1881 = vmatprep.subr.bf16.mxu1 %v1880_v18  ;;  %v254_v14 = vld [vmem:[#allocation2 + $0x5c0] sm:$0xff]  ;;  %v224_v17 = vld [vmem:[#allocation2 + $0x4d0] sm:$0xff] }
  0xf1   :  { %1272 = vmatprep.mubr.f32.mxu0 %v2041_v30  ;;  %1343 = vmatprep.mubr.f32.mxu1 %v2041_v30  ;;  %v256_v18 = vld [vmem:[#allocation2 + $0x5d0] sm:$0xff]  ;;  %v1902_v23 = vpack.c.bf16 %v254_v14, %v222_v13  ;;  %v1952_v13 = vpack.c.bf16 %v325_v7, %v293_v6  ;;  %v322_v14 = vld [vmem:[#allocation2 + $0x7e0] sm:$0xff] }
  0xf2   :  { %v1918_v24 = vpack.c.bf16 %v256_v18, %v224_v17 }
  0xf3   :  { %1867 = vmatpush1.bf16.msra.mxu0 %v1866_v25  ;;  %1883 = vmatpush1.bf16.msra.mxu1 %v1882_v26  ;;  %v286_v25 = vld [vmem:[#allocation2 + $0x6c0] sm:$0xff] }
  0xf4   :  { %1869 = vmatprep.subr.bf16.mxu0 %v1868_v29  ;;  %1885 = vmatprep.subr.bf16.mxu1 %v1884_v31  ;;  %v318_v26 = vld [vmem:[#allocation2 + $0x7c0] sm:$0xff]  ;;  %v288_v29 = vld [vmem:[#allocation2 + $0x6d0] sm:$0xff] }
  0xf5   :  { %v320_v31 = vld [vmem:[#allocation2 + $0x7d0] sm:$0xff]  ;;  %v1906_v36 = vpack.c.bf16 %v318_v26, %v286_v25 }
  0xf6   :  { %v1922_v37 = vpack.c.bf16 %v320_v31, %v288_v29 }
  0xf7   :  { %1871 = vmatpush1.bf16.msra.mxu0 %v1870_v38  ;;  %1887 = vmatpush1.bf16.msra.mxu1 %v1886_v39  ;;  %v98_v38 = vld [vmem:[#allocation2 + $0xe0] sm:$0xff] }
  0xf8   :  { %1873 = vmatprep.subr.bf16.mxu0 %v1872_v42  ;;  %1889 = vmatprep.subr.bf16.mxu1 %v1888_v43  ;;  %v130_v39 = vld [vmem:[#allocation2 + $0x1e0] sm:$0xff]  ;;  %v100_v42 = vld [vmem:[#allocation2 + $0xf0] sm:$0xff] }
  0xf9   :  { %v132_v43 = vld [vmem:[#allocation2 + $0x1f0] sm:$0xff]  ;;  %v1926_v48 = vpack.c.bf16 %v130_v39, %v98_v38 }
  0xfa   :  { %v1942_v49 = vpack.c.bf16 %v132_v43, %v100_v42 }
  0xfb   :  { %1875 = vmatpush1.bf16.msra.mxu0 %v1874_v50  ;;  %1891 = vmatpush1.bf16.msra.mxu1 %v1890_v51  ;;  %v162_v50 = vld [vmem:[#allocation2 + $0x2e0] sm:$0xff] }
  0xfc   :  { %1893 = vmatprep.subr.bf16.mxu0 %v1892_v54  ;;  %1909 = vmatprep.subr.bf16.mxu1 %v1908_v55  ;;  %v194_v51 = vld [vmem:[#allocation2 + $0x3e0] sm:$0xff]  ;;  %v164_v54 = vld [vmem:[#allocation2 + $0x2f0] sm:$0xff] }
  0xfd   :  { %v196_v55 = vld [vmem:[#allocation2 + $0x3f0] sm:$0xff]  ;;  %v1930_v60 = vpack.c.bf16 %v194_v51, %v162_v50 }
  0xfe   :  { %1694 = vmatmul.mubr.msk.f32.vlgmr.msra.gmra.mrb[10].mxu0 %vm494_vm0, %v2108_v10  ;;  %1695 = vmatmul.mubr.msk.f32.vlgmr.msra.gmra.mrb[10].mxu1 %vm494_vm0, %v2108_v10  ;;  %v1946_v61 = vpack.c.bf16 %v196_v55, %v164_v54 }
  0xff   :  { %1895 = vmatpush1.bf16.msra.mxu0 %v1894_v62  ;;  %1911 = vmatpush1.bf16.msra.mxu1 %v1910_v63  ;;  %v226_v62 = vld [vmem:[#allocation2 + $0x4e0] sm:$0xff] }
 0x100   :  { %1897 = vmatprep.subr.bf16.mxu0 %v1896_v2  ;;  %1913 = vmatprep.subr.bf16.mxu1 %v1912_v3  ;;  %v258_v63 = vld [vmem:[#allocation2 + $0x5e0] sm:$0xff]  ;;  %v228_v2 = vld [vmem:[#allocation2 + $0x4f0] sm:$0xff] }
 0x101   :  { %1414 = vmatprep.mubr.f32.mxu0 %v2041_v30  ;;  %1485 = vmatprep.mubr.f32.mxu1 %v2041_v30  ;;  %v260_v3 = vld [vmem:[#allocation2 + $0x5f0] sm:$0xff]  ;;  %v1934_v8 = vpack.c.bf16 %v258_v63, %v226_v62 }
 0x102   :  { %v1950_v9 = vpack.c.bf16 %v260_v3, %v228_v2 }
 0x103   :  { %1899 = vmatpush1.bf16.msra.mxu0 %v1898_v11  ;;  %1915 = vmatpush1.bf16.msra.mxu1 %v1914_v12  ;;  %v290_v11 = vld [vmem:[#allocation2 + $0x6e0] sm:$0xff]  ;;  %v1936_v12 = vpack.c.bf16 %v323_v5, %v291_v4 }
 0x104   :  { %1901 = vmatprep.subr.bf16.mxu0 %v1900_v15  ;;  %1917 = vmatprep.subr.bf16.mxu1 %v1916_v16  ;;  %v292_v15 = vld [vmem:[#allocation2 + $0x6f0] sm:$0xff]  ;;  %v1938_v17 = vpack.c.bf16 %v322_v14, %v290_v11 }
 0x105   :  { %v324_v16 = vld [vmem:[#allocation2 + $0x7f0] sm:$0xff] }
 0x106   :  { %v1954_v18 = vpack.c.bf16 %v324_v16, %v292_v15  ;;  %v328_v15 = vld [vmem:[#allocation5 + $0x10] sm:$0xff] }
 0x107   :  { %1903 = vmatpush1.bf16.msra.mxu0 %v1902_v23  ;;  %1919 = vmatpush1.bf16.msra.mxu1 %v1918_v24 }
 0x108   :  { %1905 = vmatprep.subr.bf16.mxu0 %v1904_v27  ;;  %1921 = vmatprep.subr.bf16.mxu1 %v1920_v28 }
 0x10b   :  { %1907 = vmatpush1.bf16.msra.mxu0 %v1906_v36  ;;  %1923 = vmatpush1.bf16.msra.mxu1 %v1922_v37 }
 0x10c   :  { %1925 = vmatprep.subr.bf16.mxu0 %v1924_v40  ;;  %1941 = vmatprep.subr.bf16.mxu1 %v1940_v41 }
 0x10e   :  { %1696 = vmatmul.mubr.msk.f32.vlgmr.msra.gmra.mrb[12].mxu0 %vm494_vm0, %v2108_v10  ;;  %1697 = vmatmul.mubr.msk.f32.vlgmr.msra.gmra.mrb[12].mxu1 %vm494_vm0, %v2108_v10 }
 0x10f   :  { %1927 = vmatpush1.bf16.msra.mxu0 %v1926_v48  ;;  %1943 = vmatpush1.bf16.msra.mxu1 %v1942_v49 }
 0x110   :  { %1929 = vmatprep.subr.bf16.mxu0 %v1928_v52  ;;  %1945 = vmatprep.subr.bf16.mxu1 %v1944_v53  ;;  %v327_v53 = vld [vmem:[#allocation5 + $0x8] sm:$0xff] }
 0x111   :  { %1556 = vmatprep.mubr.f32.mxu0 %v2041_v30  ;;  %1627 = vmatprep.mubr.f32.mxu1 %v2041_v30  ;;  %v334_v30 = vlaneseq }
 0x113   :  { %1931 = vmatpush1.bf16.msra.mxu0 %v1930_v60  ;;  %1947 = vmatpush1.bf16.msra.mxu1 %v1946_v61  ;;  %v335_v19 = vshrl.u32 %v334_v30, 7 }
 0x114   :  { %1933 = vmatprep.subr.bf16.mxu0 %v1932_v0  ;;  %1949 = vmatprep.subr.bf16.mxu1 %v1948_v1 }
 0x115   :  { %v2156_v20 = vsub.s32 0, %v335_v19  ;;  %v2158_v21 = vsub.s32 2, %v335_v19  ;;  %v2160_v23 = vsub.s32 1, %v335_v19  ;;  %v2162_v24 = vsub.s32 3, %v335_v19 }
 0x116   :  { %v2168_v37 = vsub.s32 4, %v335_v19  ;;  %v2170_v38 = vsub.s32 6, %v335_v19  ;;  %v2172_v39 = vsub.s32 5, %v335_v19  ;;  %v2174_v40 = vsub.s32 7, %v335_v19 }
 0x117   :  { %1935 = vmatpush1.bf16.msra.mxu0 %v1934_v8  ;;  %1951 = vmatpush1.bf16.msra.mxu1 %v1950_v9  ;;  %v337_v25 = vrot.slane %v326_v22, %v2156_v20  ;;  %v345_v26 = vrot.slane %v326_v22, %v2158_v21  ;;  %v341_v27 = vrot.slane %v326_v22, %v2160_v23 }
 0x118   :  { %1937 = vmatprep.subr.bf16.mxu0 %v1936_v12  ;;  %1953 = vmatprep.subr.bf16.mxu1 %v1952_v13  ;;  %v349_v28 = vrot.slane %v326_v22, %v2162_v24  ;;  %v353_v41 = vrot.slane %v326_v22, %v2168_v37  ;;  %v361_v42 = vrot.slane %v326_v22, %v2170_v38 }
 0x119   :  { %v357_v43 = vrot.slane %v326_v22, %v2172_v39  ;;  %v365_v44 = vrot.slane %v326_v22, %v2174_v40  ;;  %v369_v54 = vrot.slane %v327_v53, %v2156_v20  ;;  %v377_v55 = vrot.slane %v327_v53, %v2158_v21 }
 0x11a   :  { %v373_v56 = vrot.slane %v327_v53, %v2160_v23  ;;  %v381_v57 = vrot.slane %v327_v53, %v2162_v24  ;;  %v385_v2 = vrot.slane %v327_v53, %v2168_v37  ;;  %v393_v3 = vrot.slane %v327_v53, %v2170_v38 }
 0x11b   :  { %1939 = vmatpush1.bf16.msra.mxu0 %v1938_v17  ;;  %1955 = vmatpush1.bf16.msra.mxu1 %v1954_v18  ;;  %v389_v4 = vrot.slane %v327_v53, %v2172_v39  ;;  %v397_v5 = vrot.slane %v327_v53, %v2174_v40  ;;  %v401_v16 = vrot.slane %v328_v15, %v2156_v20 }
 0x11c   :  { %v409_v17 = vrot.slane %v328_v15, %v2158_v21  ;;  %v405_v18 = vrot.slane %v328_v15, %v2160_v23  ;;  %v413_v30 = vrot.slane %v328_v15, %v2162_v24 }
 0x11e   :  { %1698 = vmatmul.mubr.msk.f32.vlgmr.msra.gmra.mrb[14].mxu0 %vm494_vm0, %v2108_v10  ;;  %1699 = vmatmul.mubr.msk.f32.vlgmr.msra.gmra.mrb[14].mxu1 %vm494_vm0, %v2108_v10 }
 0x181   :  { %v564_v10 = vpop.f32.mrb[0].mxu0  ;;  %v635_v29 = vpop.f32.mrb[0].mxu1 }
 0x182   :  { %v565_v31 = vadd.f32 %v564_v10, %v337_v25  ;;  %v636_v32 = vadd.f32 %v635_v29, %v345_v26  ;;  %v566_v33 = vpop.f32.mrb[1].mxu0  ;;  %v637_v34 = vpop.f32.mrb[1].mxu1 }
 0x183   :  { %v567_v35 = vadd.f32 %v566_v33, %v341_v27  ;;  %v638_v36 = vadd.f32 %v637_v34, %v349_v28  ;;  %v421_v33 = vrot.slane %v328_v15, %v2172_v39  ;;  %v429_v34 = vrot.slane %v328_v15, %v2174_v40 }
 0x184   :  { %1634 = vst [vmem:[#allocation7] sm:$0xff] %v565_v31  ;;  %1636 = vst [vmem:[#allocation7 + $0x10] sm:$0xff] %v636_v32  ;;  %v417_v31 = vrot.slane %v328_v15, %v2168_v37  ;;  %v425_v32 = vrot.slane %v328_v15, %v2170_v38 }
 0x185   :  { %1635 = vst [vmem:[#allocation7 + $0x8] sm:$0xff] %v567_v35  ;;  %1637 = vst [vmem:[#allocation7 + $0x18] sm:$0xff] %v638_v36 }
 0x191   :  { %v706_v45 = vpop.f32.mrb[2].mxu0  ;;  %v777_v46 = vpop.f32.mrb[2].mxu1 }
 0x192   :  { %v707_v47 = vadd.f32 %v706_v45, %v353_v41  ;;  %v778_v48 = vadd.f32 %v777_v46, %v361_v42  ;;  %v708_v49 = vpop.f32.mrb[3].mxu0  ;;  %v779_v50 = vpop.f32.mrb[3].mxu1 }
 0x193   :  { %v709_v51 = vadd.f32 %v708_v49, %v357_v43  ;;  %v780_v52 = vadd.f32 %v779_v50, %v365_v44 }
 0x194   :  { %1638 = vst [vmem:[#allocation7 + $0x20] sm:$0xff] %v707_v47  ;;  %1640 = vst [vmem:[#allocation7 + $0x30] sm:$0xff] %v778_v48  ;;  %v329_v47 = vld [vmem:[#allocation5 + $0x18] sm:$0xff] }
 0x195   :  { %1639 = vst [vmem:[#allocation7 + $0x28] sm:$0xff] %v709_v51  ;;  %1641 = vst [vmem:[#allocation7 + $0x38] sm:$0xff] %v780_v52  ;;  %v433_v48 = vrot.slane %v329_v47, %v2156_v20  ;;  %v441_v49 = vrot.slane %v329_v47, %v2158_v21  ;;  %v437_v50 = vrot.slane %v329_v47, %v2160_v23 }
 0x196   :  { %v445_v51 = vrot.slane %v329_v47, %v2162_v24  ;;  %v449_v20 = vrot.slane %v329_v47, %v2168_v37  ;;  %v457_v21 = vrot.slane %v329_v47, %v2170_v38  ;;  %v453_v23 = vrot.slane %v329_v47, %v2172_v39 }
 0x197   :  { %v461_v24 = vrot.slane %v329_v47, %v2174_v40 }
 0x1a1   :  { %v848_v58 = vpop.f32.mrb[4].mxu0  ;;  %v919_v59 = vpop.f32.mrb[4].mxu1 }
 0x1a2   :  { %v849_v60 = vadd.f32 %v848_v58, %v369_v54  ;;  %v920_v61 = vadd.f32 %v919_v59, %v377_v55  ;;  %v850_v62 = vpop.f32.mrb[5].mxu0  ;;  %v921_v63 = vpop.f32.mrb[5].mxu1 }
 0x1a3   :  { %v851_v0 = vadd.f32 %v850_v62, %v373_v56  ;;  %v922_v1 = vadd.f32 %v921_v63, %v381_v57 }
 0x1a4   :  { %1642 = vst [vmem:[#allocation7 + $0x40] sm:$0xff] %v849_v60  ;;  %1644 = vst [vmem:[#allocation7 + $0x50] sm:$0xff] %v920_v61 }
 0x1a5   :  { %1643 = vst [vmem:[#allocation7 + $0x48] sm:$0xff] %v851_v0  ;;  %1645 = vst [vmem:[#allocation7 + $0x58] sm:$0xff] %v922_v1 }
 0x1b1   :  { %v990_v6 = vpop.f32.mrb[6].mxu0  ;;  %v1061_v7 = vpop.f32.mrb[6].mxu1 }
 0x1b2   :  { %v991_v8 = vadd.f32 %v990_v6, %v385_v2  ;;  %v1062_v9 = vadd.f32 %v1061_v7, %v393_v3  ;;  %v992_v11 = vpop.f32.mrb[7].mxu0  ;;  %v1063_v12 = vpop.f32.mrb[7].mxu1 }
 0x1b3   :  { %v993_v13 = vadd.f32 %v992_v11, %v389_v4  ;;  %v1064_v14 = vadd.f32 %v1063_v12, %v397_v5 }
 0x1b4   :  { %1646 = vst [vmem:[#allocation7 + $0x60] sm:$0xff] %v991_v8  ;;  %1648 = vst [vmem:[#allocation7 + $0x70] sm:$0xff] %v1062_v9 }
 0x1b5   :  { %1647 = vst [vmem:[#allocation7 + $0x68] sm:$0xff] %v993_v13  ;;  %1649 = vst [vmem:[#allocation7 + $0x78] sm:$0xff] %v1064_v14 }
 0x1c1   :  { %v1132_v19 = vpop.f32.mrb[8].mxu0  ;;  %v1203_v22 = vpop.f32.mrb[8].mxu1 }
 0x1c2   :  { %v1133_v25 = vadd.f32 %v1132_v19, %v401_v16  ;;  %v1204_v26 = vadd.f32 %v1203_v22, %v409_v17  ;;  %v1134_v27 = vpop.f32.mrb[9].mxu0  ;;  %v1205_v28 = vpop.f32.mrb[9].mxu1 }
 0x1c3   :  { %v1135_v10 = vadd.f32 %v1134_v27, %v405_v18  ;;  %v1206_v29 = vadd.f32 %v1205_v28, %v413_v30 }
 0x1c4   :  { %1650 = vst [vmem:[#allocation7 + $0x80] sm:$0xff] %v1133_v25  ;;  %1652 = vst [vmem:[#allocation7 + $0x90] sm:$0xff] %v1204_v26 }
 0x1c5   :  { %1651 = vst [vmem:[#allocation7 + $0x88] sm:$0xff] %v1135_v10  ;;  %1653 = vst [vmem:[#allocation7 + $0x98] sm:$0xff] %v1206_v29 }
 0x1d1   :  { %v1274_v35 = vpop.f32.mrb[10].mxu0  ;;  %v1345_v36 = vpop.f32.mrb[10].mxu1 }
 0x1d2   :  { %v1275_v41 = vadd.f32 %v1274_v35, %v417_v31  ;;  %v1346_v42 = vadd.f32 %v1345_v36, %v425_v32  ;;  %v1276_v43 = vpop.f32.mrb[11].mxu0  ;;  %v1347_v44 = vpop.f32.mrb[11].mxu1 }
 0x1d3   :  { %v1277_v45 = vadd.f32 %v1276_v43, %v421_v33  ;;  %v1348_v46 = vadd.f32 %v1347_v44, %v429_v34 }
 0x1d4   :  { %1654 = vst [vmem:[#allocation7 + $0xa0] sm:$0xff] %v1275_v41  ;;  %1656 = vst [vmem:[#allocation7 + $0xb0] sm:$0xff] %v1346_v42 }
 0x1d5   :  { %1655 = vst [vmem:[#allocation7 + $0xa8] sm:$0xff] %v1277_v45  ;;  %1657 = vst [vmem:[#allocation7 + $0xb8] sm:$0xff] %v1348_v46 }
 0x1e1   :  { %v1416_v52 = vpop.f32.mrb[12].mxu0  ;;  %v1487_v53 = vpop.f32.mrb[12].mxu1 }
 0x1e2   :  { %v1417_v54 = vadd.f32 %v1416_v52, %v433_v48  ;;  %v1488_v55 = vadd.f32 %v1487_v53, %v441_v49  ;;  %v1418_v56 = vpop.f32.mrb[13].mxu0  ;;  %v1489_v57 = vpop.f32.mrb[13].mxu1 }
 0x1e3   :  { %v1419_v58 = vadd.f32 %v1418_v56, %v437_v50  ;;  %v1490_v59 = vadd.f32 %v1489_v57, %v445_v51 }
 0x1e4   :  { %1658 = vst [vmem:[#allocation7 + $0xc0] sm:$0xff] %v1417_v54  ;;  %1660 = vst [vmem:[#allocation7 + $0xd0] sm:$0xff] %v1488_v55 }
 0x1e5   :  { %1659 = vst [vmem:[#allocation7 + $0xc8] sm:$0xff] %v1419_v58  ;;  %1661 = vst [vmem:[#allocation7 + $0xd8] sm:$0xff] %v1490_v59 }
 0x1f1   :  { %v1558_v60 = vpop.f32.mrb[14].mxu0  ;;  %v1629_v61 = vpop.f32.mrb[14].mxu1 }
 0x1f2   :  { %v1559_v62 = vadd.f32 %v1558_v60, %v449_v20  ;;  %v1630_v63 = vadd.f32 %v1629_v61, %v457_v21  ;;  %v1560_v0 = vpop.f32.mrb[15].mxu0  ;;  %v1631_v1 = vpop.f32.mrb[15].mxu1 }
 0x1f3   :  { %v1561_v2 = vadd.f32 %v1560_v0, %v453_v23  ;;  %v1632_v3 = vadd.f32 %v1631_v1, %v461_v24 }
 0x1f4   :  { %1662 = vst [vmem:[#allocation7 + $0xe0] sm:$0xff] %v1559_v62  ;;  %1664 = vst [vmem:[#allocation7 + $0xf0] sm:$0xff] %v1630_v63 }
 0x1f5   :  { %1663 = vst [vmem:[#allocation7 + $0xe8] sm:$0xff] %v1561_v2  ;;  %1665 = vst [vmem:[#allocation7 + $0xf8] sm:$0xff] %v1632_v3 }
 0x1f6   :  { %2019 = shalt.err (!%p2016_p6)
}
 0x1f7   :  { %s2020_s25 = scalar_lea.hbm %s2221_s5, 4096 }
 0x1f8   :  { %p2021_p7 = scmp.ne.s32.totalorder %s2221_s5, %s2020_s25  ;;  %p2024_p8 = scmp.lt.u32.totalorder %s2020_s25, %s2221_s5 }
 0x1fa   :  { %p2026_p9 = pnand %p2024_p8, %p2021_p7 }
 0x1fc   :  { %2029 = shalt.err (!%p2026_p9)
}
 0x1fd   :  { %1675 = dma.vmem_to_hbm [thread:$0]  %s1673_s2, 4096, %s2221_s5, [#allocation4]  }
 0x1fe   :  { %2034 = dma.done.wait [#allocation4], 4096  }
 0x1ff   :  { %2035 = vsyncadd [#allocation4], 4294963200 }
 0x200   :  { %1679 = vsyncpa [#allocation3], 1 }
 0x201   :  { %1680 = vsyncpa [#allocation6], 1 }
 0x202   :  { %1681 = vsyncpa [#allocation4], 1 }

</bundles_post_ra>
